<compile_context>
chip_gen: v7x
topology: tpu7x:2x2x1
jax: 0.10.0
libtpu: 0.0.40
codegen_flags: <defaults>
</compile_context>

<pallas_src>
import functools

import jax
import jax.numpy as jnp
from jax.experimental import pallas as pl
from jax.experimental.pallas import tpu as pltpu

INPUT_DIM = 6
HIDDEN_DIM = 128
OUTPUT_DIM = 5
K_PAD = 8      # input features padded 6 -> 8 (one f32 sublane tile)
OUT_PAD = 8    # output features padded 5 -> 8


def _round_up(n, m):
    return ((n + m - 1) // m) * m


def _mlp_kernel(x_ref, w1_ref, b1_ref, w2_ref, b2_ref, w3_ref, b3_ref, o_ref):
    # x_ref:  (TB, 8)    zero-padded input features
    # w1_ref: (8, 128)   (in, out), rows 6..7 are zero
    # b1_ref: (1, 128)
    # w2_ref: (128, 128) (in, out)
    # b2_ref: (1, 128)
    # w3_ref: (128, 8)   (in, out), cols 5..7 are zero
    # b3_ref: (1, 8)     cols 5..7 are zero
    # o_ref:  (TB, 8)
    x = x_ref[...]

    h1 = jnp.dot(x, w1_ref[...], preferred_element_type=jnp.float32) + b1_ref[...]
    h1 = jnp.maximum(h1, 0.0)

    h2 = jnp.dot(h1, w2_ref[...], preferred_element_type=jnp.float32) + b2_ref[...]
    h2 = jnp.maximum(h2, 0.0)

    out = jnp.dot(h2, w3_ref[...], preferred_element_type=jnp.float32) + b3_ref[...]
    o_ref[...] = out.astype(o_ref.dtype)


def prepare_params(params):
    """Transpose PyTorch (out, in) weights to (in, out) and zero-pad once.

    Call this once (at init / load time); pass the result to behavior_cloning_forward
    so the transpose/pad is not re-executed on every forward call.
    """
    w1 = jnp.zeros((K_PAD, HIDDEN_DIM), jnp.float32).at[:INPUT_DIM, :].set(
        params["w1"].T.astype(jnp.float32))
    b1 = params["b1"].reshape(1, HIDDEN_DIM).astype(jnp.float32)
    w2 = params["w2"].T.astype(jnp.float32)
    b2 = params["b2"].reshape(1, HIDDEN_DIM).astype(jnp.float32)
    w3 = jnp.zeros((HIDDEN_DIM, OUT_PAD), jnp.float32).at[:, :OUTPUT_DIM].set(
        params["w3"].T.astype(jnp.float32))
    b3 = jnp.zeros((1, OUT_PAD), jnp.float32).at[0, :OUTPUT_DIM].set(
        params["b3"].astype(jnp.float32))
    return {"w1": w1, "b1": b1, "w2": w2, "b2": b2, "w3": w3, "b3": b3}


@functools.partial(jax.jit, static_argnames=("tb",))
def behavior_cloning_forward(x, padded_params, *, tb=1024):
    """x: (B, INPUT_DIM) float32. padded_params: output of prepare_params()."""
    B = x.shape[0]
    tb_eff = min(tb, _round_up(B, 8))          # never larger than (padded) batch
    Bp = _round_up(B, tb_eff)

    # Pad 6 -> 8 feature lanes and batch -> multiple of the tile (tiny HBM cost:
    # 32 B/row instead of the previous 512 B/row padded materialization).
    x_pad = jnp.pad(x.astype(jnp.float32),
                    ((0, Bp - B), (0, K_PAD - INPUT_DIM)))

    grid = (Bp // tb_eff,)

    flops = 2 * Bp * (K_PAD * HIDDEN_DIM
                      + HIDDEN_DIM * HIDDEN_DIM
                      + HIDDEN_DIM * OUT_PAD)
    bytes_accessed = 4 * (Bp * K_PAD + Bp * OUT_PAD
                          + K_PAD * HIDDEN_DIM + HIDDEN_DIM * HIDDEN_DIM
                          + HIDDEN_DIM * OUT_PAD + 2 * HIDDEN_DIM + OUT_PAD)

    out_pad = pl.pallas_call(
        _mlp_kernel,
        out_shape=jax.ShapeDtypeStruct((Bp, OUT_PAD), jnp.float32),
        grid=grid,
        in_specs=[
            pl.BlockSpec((tb_eff, K_PAD), lambda i: (i, 0)),          # x tile
            pl.BlockSpec((K_PAD, HIDDEN_DIM), lambda i: (0, 0)),      # w1 (resident)
            pl.BlockSpec((1, HIDDEN_DIM), lambda i: (0, 0)),          # b1
            pl.BlockSpec((HIDDEN_DIM, HIDDEN_DIM), lambda i: (0, 0)), # w2
            pl.BlockSpec((1, HIDDEN_DIM), lambda i: (0, 0)),          # b2
            pl.BlockSpec((HIDDEN_DIM, OUT_PAD), lambda i: (0, 0)),    # w3
            pl.BlockSpec((1, OUT_PAD), lambda i: (0, 0)),             # b3
        ],
        out_specs=pl.BlockSpec((tb_eff, OUT_PAD), lambda i: (i, 0)),
        compiler_params=pltpu.CompilerParams(
            dimension_semantics=("parallel",),
        ),
        cost_estimate=pl.CostEstimate(
            flops=flops, transcendentals=0, bytes_accessed=bytes_accessed),
    )(
        x_pad,
        padded_params["w1"], padded_params["b1"],
        padded_params["w2"], padded_params["b2"],
        padded_params["w3"], padded_params["b3"],
    )

    return out_pad[:B, :OUTPUT_DIM]


def init_params(key):
    """Deterministic init matching the PyTorch module's layer shapes
    (uniform +-1/sqrt(fan_in), like nn.Linear's default)."""
    ks = jax.random.split(key, 6)

    def lin(kw, kb, fan_in, fan_out):
        bound = 1.0 / jnp.sqrt(float(fan_in))
        w = jax.random.uniform(kw, (fan_out, fan_in), jnp.float32, -bound, bound)
        b = jax.random.uniform(kb, (fan_out,), jnp.float32, -bound, bound)
        return w, b

    w1, b1 = lin(ks[0], ks[1], INPUT_DIM, HIDDEN_DIM)
    w2, b2 = lin(ks[2], ks[3], HIDDEN_DIM, HIDDEN_DIM)
    w3, b3 = lin(ks[4], ks[5], HIDDEN_DIM, OUTPUT_DIM)
    return {"w1": w1, "b1": b1, "w2": w2, "b2": b2, "w3": w3, "b3": b3}


def reference_forward(x, p):
    h1 = jnp.maximum(x @ p["w1"].T + p["b1"], 0.0)
    h2 = jnp.maximum(h1 @ p["w2"].T + p["b2"], 0.0)
    return h2 @ p["w3"].T + p["b3"]


if __name__ == "__main__":
    key = jax.random.PRNGKey(0)
    k_x1, k_x2, k_p = jax.random.split(key, 3)

    params = init_params(k_p)
    padded_params = prepare_params(params)  # done once, outside the per-call path

    # Small batch (single grid step).
    B1 = 8
    x1 = jax.random.normal(k_x1, (B1, INPUT_DIM), jnp.float32)
    out1 = jax.block_until_ready(behavior_cloning_forward(x1, padded_params))
    ref1 = reference_forward(x1, params)
    assert out1.shape == (B1, OUTPUT_DIM), out1.shape
    assert jnp.allclose(out1, ref1, atol=1e-4, rtol=1e-4), "mismatch vs reference (B=8)"

    # Larger ragged batch with a small tile to exercise the grid + batch padding.
    B2 = 300
    x2 = jax.random.normal(k_x2, (B2, INPUT_DIM), jnp.float32)
    out2 = jax.block_until_ready(behavior_cloning_forward(x2, padded_params, tb=128))
    ref2 = reference_forward(x2, params)
    assert out2.shape == (B2, OUTPUT_DIM), out2.shape
    assert jnp.allclose(out2, ref2, atol=1e-4, rtol=1e-4), "mismatch vs reference (B=300)"

    print("KERNEL_OK")
</pallas_src>

<mosaic_0001>
module attributes {stable_mosaic.version = 11 : i64} {
  func.func @_mlp_kernel(%arg0: i32, %arg1: memref<8x8xf32, #tpu.memory_space<vmem>>, %arg2: memref<8x128xf32, #tpu.memory_space<vmem>>, %arg3: memref<1x128xf32, #tpu.memory_space<vmem>>, %arg4: memref<128x128xf32, #tpu.memory_space<vmem>>, %arg5: memref<1x128xf32, #tpu.memory_space<vmem>>, %arg6: memref<128x8xf32, #tpu.memory_space<vmem>>, %arg7: memref<1x8xf32, #tpu.memory_space<vmem>>, %arg8: memref<8x8xf32, #tpu.memory_space<vmem>>) attributes {dimension_semantics = [#tpu.dimension_semantics<parallel>], iteration_bounds = array<i64: 1>, scalar_prefetch = 0 : i64, scratch_operands = 0 : i64, tpu.core_type = #tpu.core_type<tc>, window_params = [{transform_indices = @transform_0, window_bounds = array<i64: 8, 8>}, {pipeline_mode = #tpu.pipeline_mode<synchronous>, transform_indices = @transform_1, window_bounds = array<i64: 8, 128>}, {pipeline_mode = #tpu.pipeline_mode<synchronous>, transform_indices = @transform_2, window_bounds = array<i64: 1, 128>}, {pipeline_mode = #tpu.pipeline_mode<synchronous>, transform_indices = @transform_3, window_bounds = array<i64: 128, 128>}, {pipeline_mode = #tpu.pipeline_mode<synchronous>, transform_indices = @transform_4, window_bounds = array<i64: 1, 128>}, {pipeline_mode = #tpu.pipeline_mode<synchronous>, transform_indices = @transform_5, window_bounds = array<i64: 128, 8>}, {pipeline_mode = #tpu.pipeline_mode<synchronous>, transform_indices = @transform_6, window_bounds = array<i64: 1, 8>}, {transform_indices = @transform_7, window_bounds = array<i64: 8, 8>}]} {
    %c0 = arith.constant 0 : index
    %c0_0 = arith.constant 0 : index
    %0 = vector.load %arg1[%c0, %c0_0] : memref<8x8xf32, #tpu.memory_space<vmem>>, vector<8x8xf32>
    %c0_1 = arith.constant 0 : index
    %c0_2 = arith.constant 0 : index
    %1 = vector.load %arg2[%c0_1, %c0_2] : memref<8x128xf32, #tpu.memory_space<vmem>>, vector<8x128xf32>
    %cst = arith.constant dense<0.000000e+00> : vector<8x128xf32>
    %2 = tpu.matmul %0, %1, %cst {dimension_numbers = #tpu.dot_dimension_numbers<[1], [0], [0], [1], [0, 0, 1, 1], [], []>} : vector<8x8xf32>, vector<8x128xf32>, vector<8x128xf32> -> vector<8x128xf32>
    %c0_3 = arith.constant 0 : index
    %c0_4 = arith.constant 0 : index
    %3 = vector.load %arg3[%c0_3, %c0_4] : memref<1x128xf32, #tpu.memory_space<vmem>>, vector<1x128xf32>
    %4 = vector.broadcast %3 : vector<1x128xf32> to vector<8x128xf32>
    %5 = arith.addf %2, %4 : vector<8x128xf32>
    %cst_5 = arith.constant 0.000000e+00 : f32
    %6 = vector.broadcast %cst_5 : f32 to vector<8x128xf32>
    %7 = arith.maximumf %5, %6 : vector<8x128xf32>
    %c0_6 = arith.constant 0 : index
    %c0_7 = arith.constant 0 : index
    %8 = vector.load %arg4[%c0_6, %c0_7] : memref<128x128xf32, #tpu.memory_space<vmem>>, vector<128x128xf32>
    %cst_8 = arith.constant dense<0.000000e+00> : vector<8x128xf32>
    %9 = tpu.matmul %7, %8, %cst_8 {dimension_numbers = #tpu.dot_dimension_numbers<[1], [0], [0], [1], [0, 0, 1, 1], [], []>} : vector<8x128xf32>, vector<128x128xf32>, vector<8x128xf32> -> vector<8x128xf32>
    %c0_9 = arith.constant 0 : index
    %c0_10 = arith.constant 0 : index
    %10 = vector.load %arg5[%c0_9, %c0_10] : memref<1x128xf32, #tpu.memory_space<vmem>>, vector<1x128xf32>
    %11 = vector.broadcast %10 : vector<1x128xf32> to vector<8x128xf32>
    %12 = arith.addf %9, %11 : vector<8x128xf32>
    %cst_11 = arith.constant 0.000000e+00 : f32
    %13 = vector.broadcast %cst_11 : f32 to vector<8x128xf32>
    %14 = arith.maximumf %12, %13 : vector<8x128xf32>
    %c0_12 = arith.constant 0 : index
    %c0_13 = arith.constant 0 : index
    %15 = vector.load %arg6[%c0_12, %c0_13] : memref<128x8xf32, #tpu.memory_space<vmem>>, vector<128x8xf32>
    %cst_14 = arith.constant dense<0.000000e+00> : vector<8x8xf32>
    %16 = tpu.matmul %14, %15, %cst_14 {dimension_numbers = #tpu.dot_dimension_numbers<[1], [0], [0], [1], [0, 0, 1, 1], [], []>} : vector<8x128xf32>, vector<128x8xf32>, vector<8x8xf32> -> vector<8x8xf32>
    %c0_15 = arith.constant 0 : index
    %c0_16 = arith.constant 0 : index
    %17 = vector.load %arg7[%c0_15, %c0_16] : memref<1x8xf32, #tpu.memory_space<vmem>>, vector<1x8xf32>
    %18 = vector.broadcast %17 : vector<1x8xf32> to vector<8x8xf32>
    %19 = arith.addf %16, %18 : vector<8x8xf32>
    %c0_17 = arith.constant 0 : index
    %c0_18 = arith.constant 0 : index
    %20 = vector.load %arg8[%c0_17, %c0_18] : memref<8x8xf32, #tpu.memory_space<vmem>>, vector<8x8xf32>
    tpu.vector_store %arg8[%c0_17, %c0_18], %19 {strides = array<i32>} : memref<8x8xf32, #tpu.memory_space<vmem>>, vector<8x8xf32>,
    return
  }
  func.func @transform_0(%arg0: i32) -> (i32, i32) {
    %c0_i32 = arith.constant 0 : i32
    %c0_i32_0 = arith.constant 0 : i32
    return %arg0, %c0_i32 : i32, i32
  }
  func.func @transform_1(%arg0: i32) -> (i32, i32) {
    %c0_i32 = arith.constant 0 : i32
    %c0_i32_0 = arith.constant 0 : i32
    %c0_i32_1 = arith.constant 0 : i32
    return %c0_i32, %c0_i32_0 : i32, i32
  }
  func.func @transform_2(%arg0: i32) -> (i32, i32) {
    %c0_i32 = arith.constant 0 : i32
    %c0_i32_0 = arith.constant 0 : i32
    %c0_i32_1 = arith.constant 0 : i32
    return %c0_i32, %c0_i32_0 : i32, i32
  }
  func.func @transform_3(%arg0: i32) -> (i32, i32) {
    %c0_i32 = arith.constant 0 : i32
    %c0_i32_0 = arith.constant 0 : i32
    %c0_i32_1 = arith.constant 0 : i32
    return %c0_i32, %c0_i32_0 : i32, i32
  }
  func.func @transform_4(%arg0: i32) -> (i32, i32) {
    %c0_i32 = arith.constant 0 : i32
    %c0_i32_0 = arith.constant 0 : i32
    %c0_i32_1 = arith.constant 0 : i32
    return %c0_i32, %c0_i32_0 : i32, i32
  }
  func.func @transform_5(%arg0: i32) -> (i32, i32) {
    %c0_i32 = arith.constant 0 : i32
    %c0_i32_0 = arith.constant 0 : i32
    %c0_i32_1 = arith.constant 0 : i32
    return %c0_i32, %c0_i32_0 : i32, i32
  }
  func.func @transform_6(%arg0: i32) -> (i32, i32) {
    %c0_i32 = arith.constant 0 : i32
    %c0_i32_0 = arith.constant 0 : i32
    %c0_i32_1 = arith.constant 0 : i32
    return %c0_i32, %c0_i32_0 : i32, i32
  }
  func.func @transform_7(%arg0: i32) -> (i32, i32) {
    %c0_i32 = arith.constant 0 : i32
    %c0_i32_0 = arith.constant 0 : i32
    return %arg0, %c0_i32 : i32, i32
  }
}

</mosaic_0001>

<bundles_post_ra>
// kernel: behavior_cloning_forward.1
= control target key start
LH: loop header
LB: loop body
LE: loop exit
PB: predicated region body
PF: predicated region fallthrough
CT: control target
= control target key end

     0   :  { %vm36_vm0 = vcmask 64512   ;;  %v504_v2 = vmov 0.0   ;;  %vm505_vm1 = vmmov 0   ;;  %v506_v6 = vmov 0.0|0.0   ;;  %s692_s0 = inlined_call_operand.vmem [shape: f32[8,8], index: 0, kind: input, shape index: {}]   ;;  %s693_s1 = inlined_call_operand.vmem [shape: f32[8,128], index: 1, kind: input, shape index: {}]   ;;  %s694_s2 = inlined_call_operand.vmem [shape: f32[1,128], index: 2, kind: input, shape index: {}]   ;;  %s695_s3 = inlined_call_operand.vmem [shape: f32[128,128], index: 3, kind: input, shape index: {}]   ;;  %s696_s4 = inlined_call_operand.vmem [shape: f32[1,128], index: 4, kind: input, shape index: {}]   ;;  %s697_s5 = inlined_call_operand.vmem [shape: f32[128,8], index: 5, kind: input, shape index: {}]   ;;  %s698_s6 = inlined_call_operand.vmem [shape: f32[1,8], index: 6, kind: input, shape index: {}]   ;;  %s699_s7 = inlined_call_operand.hbm [shape: f32[8,8], index: 7, kind: output, shape index: {}]  }
   0x1   :  { %v28_v0 = vld [vmem:[%s693_s1] sm:$0xff]  ;;  %353 = vmatprep.subr.mxu0 %v504_v2  ;;  %355 = vmatprep.mubr.msk.f32.mxu0 %vm505_vm1, %v504_v2  ;;  %v112_v4 = vld [vmem:[%s695_s3 + $0x8] sm:$0xff]  ;;  %v113_v5 = vld [vmem:[%s695_s3 + $0x10] sm:$0xff] }
   0x2   :  { %v27_v1 = vld [vmem:[%s692_s0] sm:$0xff]  ;;  %354 = vmatpush3.msra.mxu0 %v28_v0  ;;  %428 = vmatprep.subr.bf16.mxu1 %v506_v6  ;;  %v114_v8 = vld [vmem:[%s695_s3 + $0x18] sm:$0xff]  ;;  %v116_v11 = vld [vmem:[%s695_s3 + $0x28] sm:$0xff] }
   0x3   :  { %v111_v3 = vld [vmem:[%s695_s3] sm:$0xff]  ;;  %356 = vmatmul.mubr.msk.f32.vlgmr.msra.gmra.mrb[0].mxu0 %vm36_vm0, %v27_v1  ;;  %390 = vmatprep.mubr.msk.f32.mxu1 %vm505_vm1, %v504_v2  ;;  %v432_v9 = vpack.c.bf16 %v114_v8, %v113_v5 }
   0x4   :  { %v429_v7 = vpack.c.bf16 %v112_v4, %v111_v3  ;;  %452 = vmatprep.subr.bf16.mxu0 %v506_v6  ;;  %v115_v10 = vld [vmem:[%s695_s3 + $0x20] sm:$0xff]  ;;  %425 = vmatprep.mubr.msk.f32.mxu0 %vm505_vm1, %v504_v2 }
   0x6   :  { %430 = vmatpush3.bf16.msra.mxu1 %v429_v7 }
   0x7   :  { %431 = vmatprep.subr.bf16.mxu1 %v506_v6 }
   0x8   :  { %12 = vsyncpa [#allocation3], 0  ;;  %v435_v12 = vpack.c.bf16 %v116_v11, %v115_v10  ;;  %v117_v13 = vld [vmem:[%s695_s3 + $0x30] sm:$0xff]  ;;  %v118_v14 = vld [vmem:[%s695_s3 + $0x38] sm:$0xff]  ;;  %s507_s20 = smov [#allocation2]  }
   0x9   :  { %v438_v15 = vpack.c.bf16 %v118_v14, %v117_v13  ;;  %v119_v16 = vld [vmem:[%s695_s3 + $0x40] sm:$0xff]  ;;  %v120_v17 = vld [vmem:[%s695_s3 + $0x48] sm:$0xff]  ;;  %v121_v19 = vld [vmem:[%s695_s3 + $0x50] sm:$0xff]  ;;  %s305_s21 = sshll.u32 %s507_s20, 4  ;;  %s306_s21 = int_to_ptr.vmem [resolvable:$true] %s305_s21 }
   0xa   :  { %433 = vmatpush3.bf16.msra.mxu1 %v432_v9  ;;  %v441_v18 = vpack.c.bf16 %v120_v17, %v119_v16  ;;  %v122_v20 = vld [vmem:[%s695_s3 + $0x58] sm:$0xff]  ;;  %v123_v22 = vld [vmem:[%s695_s3 + $0x60] sm:$0xff]  ;;  %v124_v23 = vld [vmem:[%s695_s3 + $0x68] sm:$0xff]  ;;  %p485_p1 = scmp.lt.s32.totalorder %s306_s21, %s306_s21 }
   0xb   :  { %434 = vmatprep.subr.bf16.mxu1 %v506_v6  ;;  %v444_v21 = vpack.c.bf16 %v122_v20, %v121_v19  ;;  %v447_v24 = vpack.c.bf16 %v124_v23, %v123_v22  ;;  %v125_v25 = vld [vmem:[%s695_s3 + $0x70] sm:$0xff]  ;;  %v126_v26 = vld [vmem:[%s695_s3 + $0x78] sm:$0xff]  ;;  %v205_v28 = vld [vmem:[%s697_s5] sm:$0xff] }
   0xc   :  { %v450_v27 = vpack.c.bf16 %v126_v26, %v125_v25  ;;  %v206_v29 = vld [vmem:[%s697_s5 + $0x8] sm:$0xff]  ;;  %v207_v30 = vld [vmem:[%s697_s5 + $0x10] sm:$0xff]  ;;  %v208_v32 = vld [vmem:[%s697_s5 + $0x18] sm:$0xff] }
   0xd   :  { %v453_v31 = vpack.c.bf16 %v206_v29, %v205_v28  ;;  %v456_v33 = vpack.c.bf16 %v208_v32, %v207_v30  ;;  %v209_v34 = vld [vmem:[%s697_s5 + $0x20] sm:$0xff]  ;;  %v210_v35 = vld [vmem:[%s697_s5 + $0x28] sm:$0xff]  ;;  %v211_v37 = vld [vmem:[%s697_s5 + $0x30] sm:$0xff] }
   0xe   :  { %436 = vmatpush3.bf16.msra.mxu1 %v435_v12  ;;  %v459_v36 = vpack.c.bf16 %v210_v35, %v209_v34  ;;  %v212_v38 = vld [vmem:[%s697_s5 + $0x38] sm:$0xff]  ;;  %v213_v40 = vld [vmem:[%s697_s5 + $0x40] sm:$0xff]  ;;  %v214_v41 = vld [vmem:[%s697_s5 + $0x48] sm:$0xff] }
   0xf   :  { %437 = vmatprep.subr.bf16.mxu1 %v506_v6  ;;  %454 = vmatpush3.bf16.msra.mxu0 %v453_v31  ;;  %v462_v39 = vpack.c.bf16 %v212_v38, %v211_v37  ;;  %v465_v42 = vpack.c.bf16 %v214_v41, %v213_v40  ;;  %v215_v43 = vld [vmem:[%s697_s5 + $0x50] sm:$0xff]  ;;  %v216_v44 = vld [vmem:[%s697_s5 + $0x58] sm:$0xff]  ;;  %v217_v46 = vld [vmem:[%s697_s5 + $0x60] sm:$0xff] }
  0x10   :  { %455 = vmatprep.subr.bf16.mxu0 %v506_v6  ;;  %v468_v45 = vpack.c.bf16 %v216_v44, %v215_v43  ;;  %v218_v47 = vld [vmem:[%s697_s5 + $0x68] sm:$0xff]  ;;  %v313_v49 = vld [vmem:[%s694_s2] ss:$0 sm:$0xff]  ;;  %v219_v54 = vld [vmem:[%s697_s5 + $0x70] sm:$0xff] }
  0x11   :  { %v471_v48 = vpack.c.bf16 %v218_v47, %v217_v46  ;;  %v220_v55 = vld [vmem:[%s697_s5 + $0x78] sm:$0xff]  ;;  %v315_v57 = vld [vmem:[%s696_s4] ss:$0 sm:$0xff]  ;;  %s480_s5 = scalar_lea.vmem %s306_s21, 128 }
  0x12   :  { %439 = vmatpush3.bf16.msra.mxu1 %v438_v15  ;;  %v474_v56 = vpack.c.bf16 %v220_v55, %v219_v54  ;;  %v316_v62 = vld [vmem:[%s698_s6] ss:$0 sm:$0xff]  ;;  %p481_p0 = scmp.ne.s32.totalorder %s306_s21, %s480_s5  ;;  %p486_p2 = scmp.lt.s32.totalorder %s480_s5, %s480_s5 }
  0x13   :  { %440 = vmatprep.subr.bf16.mxu1 %v506_v6  ;;  %457 = vmatpush3.bf16.msra.mxu0 %v456_v33 }
  0x14   :  { %458 = vmatprep.subr.bf16.mxu0 %v506_v6  ;;  %p487_p3 = por %p486_p2, %p485_p1 }
  0x16   :  { %442 = vmatpush3.bf16.msra.mxu1 %v441_v18  ;;  %p488_p4 = pnand %p487_p3, %p481_p0 }
  0x17   :  { %443 = vmatprep.subr.bf16.mxu1 %v506_v6  ;;  %460 = vmatpush3.bf16.msra.mxu0 %v459_v36 }
  0x18   :  { %461 = vmatprep.subr.bf16.mxu0 %v506_v6 }
  0x1a   :  { %445 = vmatpush3.bf16.msra.mxu1 %v444_v21 }
  0x1b   :  { %446 = vmatprep.subr.bf16.mxu1 %v506_v6  ;;  %463 = vmatpush3.bf16.msra.mxu0 %v462_v39 }
  0x1c   :  { %464 = vmatprep.subr.bf16.mxu0 %v506_v6 }
  0x1e   :  { %448 = vmatpush3.bf16.msra.mxu1 %v447_v24 }
  0x1f   :  { %449 = vmatprep.subr.bf16.mxu1 %v506_v6  ;;  %466 = vmatpush3.bf16.msra.mxu0 %v465_v42 }
  0x20   :  { %467 = vmatprep.subr.bf16.mxu0 %v506_v6 }
  0x22   :  { %451 = vmatpush3.bf16.msra.mxu1 %v450_v27 }
  0x23   :  { %469 = vmatpush3.bf16.msra.mxu0 %v468_v45 }
  0x24   :  { %470 = vmatprep.subr.bf16.mxu0 %v506_v6 }
  0x27   :  { %472 = vmatpush3.bf16.msra.mxu0 %v471_v48 }
  0x28   :  { %473 = vmatprep.subr.bf16.mxu0 %v506_v6 }
  0x2b   :  { %475 = vmatpush3.bf16.msra.mxu0 %v474_v56 }
  0xd6   :  { %v106_v50 = vpop.f32.mrb[0].mxu0 }
  0xd7   :  { %v107_v51 = vadd.f32 %v313_v49, %v106_v50  ;;  %v357_v52 = vpop.f32.mrb[1].mxu0 }
  0xd9   :  { %v110_v53 = vmax.f32 %v107_v51, 0.0 }
  0xdb   :  { %391 = vmatmul.mubr.f32.vlgmr.msra.gmra.mrb[0].mxu1 %v110_v53 }
 0x1ae   :  { %v200_v58 = vpop.f32.mrb[0].mxu1 }
 0x1af   :  { %v201_v59 = vadd.f32 %v315_v57, %v200_v58  ;;  %v392_v60 = vpop.f32.mrb[1].mxu1 }
 0x1b1   :  { %v204_v61 = vmax.f32 %v201_v59, 0.0 }
 0x1b3   :  { %426 = vmatmul.mubr.f32.vlgmr.msra.gmra.mrb[2].mxu0 %v204_v61 }
 0x286   :  { %v294_v63 = vpop.f32.mrb[2].mxu0 }
 0x287   :  { %v295_v0 = vadd.f32 %v316_v62, %v294_v63  ;;  %v427_v1 = vpop.f32.mrb[3].mxu0 }
 0x289   :  { %298 = vst.msk [vmem:[#allocation2] sm:$0xff] %vm36_vm0, %v295_v0 }
 0x28a   :  { %491 = shalt.err (!%p488_p4)
}
 0x28b   :  { %s492_s23 = scalar_lea.hbm %s699_s7, 128 }
 0x28c   :  { %p493_p5 = scmp.ne.s32.totalorder %s699_s7, %s492_s23  ;;  %p496_p6 = scmp.lt.u32.totalorder %s492_s23, %s699_s7 }
 0x28e   :  { %p498_p7 = pnand %p496_p6, %p493_p5 }
 0x290   :  { %501 = shalt.err (!%p498_p7)
}
 0x291   :  { %308 = dma.vmem_to_hbm [thread:$0]  %s306_s21, 128, %s699_s7, [#allocation3]  }
 0x292   :  { %502 = dma.done.wait [#allocation3], 128  }
 0x293   :  { %503 = vsyncadd [#allocation3], 4294967168 }
 0x294   :  { %312 = vsyncpa [#allocation3], 1 }

</bundles_post_ra>
